<compile_context>
chip_gen: v7x
topology: tpu7x:2x2x1
jax: 0.10.0
libtpu: 0.0.40
codegen_flags: <defaults>
</compile_context>

<pallas_src>
import jax
import jax.numpy as jnp
from jax import lax
from jax.experimental import pallas as pl
from jax.experimental.pallas import tpu as pltpu

LANES = 128
_PALLAS_MIN_ELEMENTS = 1 << 17   # below this, XLA's fused reduce is faster


def _cdiv(a, b):
    return -(-a // b)


def _round_up(a, m):
    return _cdiv(a, m) * m


def _chip_defaults():
    """Return (tensorcores to shard over, max block rows)."""
    try:
        kind = jax.devices()[0].device_kind.lower()
    except Exception:
        kind = ""
    if "v7" in kind:
        # 2 TensorCores/chip; 8192x128 f32 = 4 MiB/input/buffer (16 MiB
        # double-buffered) -- well inside v7x's 32 MiB scoped-VMEM default.
        return 2, 8192
    # v5e / v6e: 1 TensorCore; 4096x128 f32 = 2 MiB/input/buffer (8 MiB
    # double-buffered) fits the 16 MiB (v5e) / 32 MiB (v6e) scoped defaults.
    return 1, 4096


def _make_kernel(row_tile, blocks_per_core, rows_valid, needs_mask):
    sub_blocks = row_tile // 8

    def kernel(real_ref, fake_ref, out_ref):
        # out_ref: per-core (8,128) running accumulator, resident across the
        # reduction ("arbitrary") axis.  Zero it on the first reduction step.
        @pl.when(pl.program_id(1) == 0)
        def _init():
            out_ref[...] = jnp.zeros_like(out_ref)

        real = real_ref[...].astype(jnp.float32)
        fake = fake_ref[...].astype(jnp.float32)

        # PyTorch nn.BCELoss clamps each log term at -100.
        # BCE(real, target=1) = -log(real); BCE(fake, target=0) = -log(1 - fake)
        # (kept as two separate logs for exact per-term clamp parity).
        log_r = jnp.maximum(jnp.log(real), -100.0)
        log_1mf = jnp.maximum(jnp.log(1.0 - fake), -100.0)
        s = log_r + log_1mf

        if needs_mask:
            # Global row of every element of this block; rows past the real data
            # (ragged tail / clamped overflow blocks) hold garbage -> zero them.
            block_idx = pl.program_id(0) * blocks_per_core + pl.program_id(1)
            row0 = block_idx * row_tile
            local_row = lax.broadcasted_iota(jnp.int32, (row_tile, LANES), 0)
            s = jnp.where(row0 + local_row < rows_valid, s, 0.0)

        # Sublane-block reduce to an (8,128) partial; two-level tree keeps the
        # vadd dependency chain short when row_tile is large.
        if sub_blocks % 16 == 0 and sub_blocks >= 32:
            t = s.reshape(sub_blocks // 16, 16, 8, LANES)
            partial = jnp.sum(jnp.sum(t, axis=1), axis=0)
        elif sub_blocks > 1:
            partial = jnp.sum(s.reshape(sub_blocks, 8, LANES), axis=0)
        else:
            partial = s
        out_ref[...] -= partial          # accumulate -(log_r + log_1mf)

    return kernel


def _as_lane_slab(x, neutral):
    """Flatten to (rows, 128).  Free (pure reshape) when n % 128 == 0; otherwise
    pads only the <=127-element lane tail with a neutral value."""
    flat = jnp.ravel(x)
    rem = flat.shape[0] % LANES
    if rem:
        flat = jnp.concatenate(
            [flat, jnp.full((LANES - rem,), neutral, dtype=flat.dtype)])
    return flat.reshape(-1, LANES)


def _reference(real_preds, fake_preds):
    # pure-JAX reference mirroring nn.BCELoss (mean reduction, -100 clamp)
    r = real_preds.astype(jnp.float32)
    f = fake_preds.astype(jnp.float32)
    lr = jnp.maximum(jnp.log(r), -100.0)
    lf = jnp.maximum(jnp.log(1.0 - f), -100.0)
    return jnp.mean(-lr) + jnp.mean(-lf)


def _discriminator_loss_pallas(real_preds, fake_preds):
    assert real_preds.shape == fake_preds.shape, "kernel assumes matching shapes"
    n = real_preds.size
    ncores, max_row_tile = _chip_defaults()

    # Lane-dense slabs (neutral lane-tail pad: real=1, fake=0 -> 0 contribution).
    real2d = _as_lane_slab(real_preds, 1.0)
    fake2d = _as_lane_slab(fake_preds, 0.0)
    rows = real2d.shape[0]

    rows_per_core = _cdiv(rows, ncores)
    row_tile = min(max_row_tile, _round_up(rows_per_core, 8))
    blocks_per_core = _cdiv(rows_per_core, row_tile)
    covered_rows = ncores * blocks_per_core * row_tile
    needs_mask = covered_rows != rows
    # Clamp target so no DMA block starts past the end of the slab.
    last_block = _cdiv(rows, row_tile) - 1

    def in_map(p, i):
        return (jnp.minimum(p * blocks_per_core + i, last_block), 0)

    if ncores > 1:
        dims = (getattr(pltpu, "CORE_PARALLEL", "parallel"), "arbitrary")
    else:
        dims = ("arbitrary", "arbitrary")

    partials = pl.pallas_call(
        _make_kernel(row_tile, blocks_per_core, rows, needs_mask),
        out_shape=jax.ShapeDtypeStruct((ncores * 8, LANES), jnp.float32),
        grid_spec=pltpu.PrefetchScalarGridSpec(
            num_scalar_prefetch=0,
            grid=(ncores, blocks_per_core),
            in_specs=[
                pl.BlockSpec((row_tile, LANES), in_map),
                pl.BlockSpec((row_tile, LANES), in_map),
            ],
            out_specs=pl.BlockSpec((8, LANES), lambda p, i: (p, 0)),
        ),
        compiler_params=pltpu.CompilerParams(dimension_semantics=dims),
    )(real2d, fake2d)

    # Tiny XLA epilogue: fold per-core (8,128) partials to the scalar mean loss.
    return jnp.sum(partials) * (1.0 / float(n))


def discriminator_loss(real_preds, fake_preds):
    """real_loss = BCE(real_preds, ones); fake_loss = BCE(fake_preds, zeros);
    returns real_loss + fake_loss (scalar float32, 'mean' reduction)."""
    assert real_preds.shape == fake_preds.shape, "kernel assumes matching shapes"
    if real_preds.size < _PALLAS_MIN_ELEMENTS:
        # Launch + minimum-DMA overhead dwarfs the real work at tiny sizes.
        return _reference(real_preds, fake_preds)
    return _discriminator_loss_pallas(real_preds, fake_preds)


if __name__ == "__main__":
    key = jax.random.PRNGKey(0)
    k1, k2, k3, k4 = jax.random.split(key, 4)

    # Small discriminator prediction map: batch=2, channels=4, spatial=16.
    shape = (2, 4, 16, 16)
    real_small = jax.random.uniform(k1, shape, jnp.float32, minval=1e-4, maxval=1.0 - 1e-4)
    fake_small = jax.random.uniform(k2, shape, jnp.float32, minval=1e-4, maxval=1.0 - 1e-4)

    # Exercise the Pallas kernel directly (the public wrapper would take the
    # pure-JAX small-input fallback at this size).
    loss = _discriminator_loss_pallas(real_small, fake_small)
    jax.block_until_ready(loss)
    ref = _reference(real_small, fake_small)
    assert jnp.allclose(loss, ref, rtol=1e-5, atol=1e-6), (loss, ref)

    # Public entry point on the small shape (fallback path).
    loss_pub = discriminator_loss(real_small, fake_small)
    jax.block_until_ready(loss_pub)
    assert jnp.allclose(loss_pub, ref, rtol=1e-5, atol=1e-6), (loss_pub, ref)

    # Medium shape: multi-block grid + ragged-tail masking path of the kernel.
    shape_m = (2, 3, 512, 200)   # 614400 elements -> 4800 lane rows
    real_m = jax.random.uniform(k3, shape_m, jnp.float32, minval=1e-4, maxval=1.0 - 1e-4)
    fake_m = jax.random.uniform(k4, shape_m, jnp.float32, minval=1e-4, maxval=1.0 - 1e-4)
    loss_m = discriminator_loss(real_m, fake_m)   # above threshold -> Pallas path
    jax.block_until_ready(loss_m)
    ref_m = _reference(real_m, fake_m)
    assert jnp.allclose(loss_m, ref_m, rtol=1e-4, atol=1e-6), (loss_m, ref_m)

    print("KERNEL_OK")
</pallas_src>

<mosaic_0001>
module attributes {stable_mosaic.version = 11 : i64} {
  func.func @kernel(%arg0: i32, %arg1: i32, %arg2: memref<16x128xf32, #tpu.memory_space<vmem>>, %arg3: memref<16x128xf32, #tpu.memory_space<vmem>>, %arg4: memref<8x128xf32, #tpu.memory_space<vmem>>) attributes {dimension_semantics = [#tpu.dimension_semantics<arbitrary>, #tpu.dimension_semantics<arbitrary>], iteration_bounds = array<i64: 1, 1>, scalar_prefetch = 0 : i64, scratch_operands = 0 : i64, tpu.core_type = #tpu.core_type<tc>, window_params = [{transform_indices = @transform_0, window_bounds = array<i64: 16, 128>}, {transform_indices = @transform_1, window_bounds = array<i64: 16, 128>}, {transform_indices = @transform_2, window_bounds = array<i64: 8, 128>}]} {
    %c0_i32 = arith.constant 0 : i32
    %0 = arith.cmpi eq, %arg1, %c0_i32 : i32
    %1 = arith.extui %0 : i1 to i32
    %c0_i32_0 = arith.constant 0 : i32
    %2 = arith.cmpi ne, %1, %c0_i32_0 : i32
    scf.if %2 {
      %cst_11 = arith.constant 0.000000e+00 : f32
      %19 = vector.broadcast %cst_11 : f32 to vector<8x128xf32>
      %c0_12 = arith.constant 0 : index
      %c0_13 = arith.constant 0 : index
      %20 = vector.load %arg4[%c0_12, %c0_13] : memref<8x128xf32, #tpu.memory_space<vmem>>, vector<8x128xf32>
      tpu.vector_store %arg4[%c0_12, %c0_13], %19 {strides = array<i32>} : memref<8x128xf32, #tpu.memory_space<vmem>>, vector<8x128xf32>,
    } else {
    }
    %c0 = arith.constant 0 : index
    %c0_1 = arith.constant 0 : index
    %3 = vector.load %arg2[%c0, %c0_1] : memref<16x128xf32, #tpu.memory_space<vmem>>, vector<16x128xf32>
    %c0_2 = arith.constant 0 : index
    %c0_3 = arith.constant 0 : index
    %4 = vector.load %arg3[%c0_2, %c0_3] : memref<16x128xf32, #tpu.memory_space<vmem>>, vector<16x128xf32>
    %5 = math.log %3 : vector<16x128xf32>
    %cst = arith.constant -1.000000e+02 : f32
    %6 = vector.broadcast %cst : f32 to vector<16x128xf32>
    %7 = arith.maximumf %5, %6 : vector<16x128xf32>
    %cst_4 = arith.constant 1.000000e+00 : f32
    %8 = vector.broadcast %cst_4 : f32 to vector<16x128xf32>
    %9 = arith.subf %8, %4 : vector<16x128xf32>
    %10 = math.log %9 : vector<16x128xf32>
    %cst_5 = arith.constant -1.000000e+02 : f32
    %11 = vector.broadcast %cst_5 : f32 to vector<16x128xf32>
    %12 = arith.maximumf %10, %11 : vector<16x128xf32>
    %13 = arith.addf %7, %12 : vector<16x128xf32>
    %14 = vector.shape_cast %13 : vector<16x128xf32> to vector<2x8x128xf32>
    %cst_6 = arith.constant dense<0.000000e+00> : vector<8x128xf32>
    %15 = vector.multi_reduction <add>, %14, %cst_6 [0] : vector<2x8x128xf32> to vector<8x128xf32>
    %c0_7 = arith.constant 0 : index
    %c0_8 = arith.constant 0 : index
    %16 = vector.load %arg4[%c0_7, %c0_8] : memref<8x128xf32, #tpu.memory_space<vmem>>, vector<8x128xf32>
    %17 = arith.subf %16, %15 : vector<8x128xf32>
    %c0_9 = arith.constant 0 : index
    %c0_10 = arith.constant 0 : index
    %18 = vector.load %arg4[%c0_9, %c0_10] : memref<8x128xf32, #tpu.memory_space<vmem>>, vector<8x128xf32>
    tpu.vector_store %arg4[%c0_9, %c0_10], %17 {strides = array<i32>} : memref<8x128xf32, #tpu.memory_space<vmem>>, vector<8x128xf32>,
    return
  }
  func.func @transform_0(%arg0: i32, %arg1: i32) -> (i32, i32) {
    %c1_i32 = arith.constant 1 : i32
    %0 = arith.muli %arg0, %c1_i32 : i32
    %1 = arith.addi %0, %arg1 : i32
    %c0_i32 = arith.constant 0 : i32
    %2 = arith.minsi %1, %c0_i32 : i32
    %c0_i32_0 = arith.constant 0 : i32
    %c0_i32_1 = arith.constant 0 : i32
    return %2, %c0_i32_0 : i32, i32
  }
  func.func @transform_1(%arg0: i32, %arg1: i32) -> (i32, i32) {
    %c1_i32 = arith.constant 1 : i32
    %0 = arith.muli %arg0, %c1_i32 : i32
    %1 = arith.addi %0, %arg1 : i32
    %c0_i32 = arith.constant 0 : i32
    %2 = arith.minsi %1, %c0_i32 : i32
    %c0_i32_0 = arith.constant 0 : i32
    %c0_i32_1 = arith.constant 0 : i32
    return %2, %c0_i32_0 : i32, i32
  }
  func.func @transform_2(%arg0: i32, %arg1: i32) -> (i32, i32) {
    %c0_i32 = arith.constant 0 : i32
    %c0_i32_0 = arith.constant 0 : i32
    return %arg0, %c0_i32 : i32, i32
  }
}

</mosaic_0001>

<bundles_post_ra>
// kernel: tpu_custom_call.1
= control target key start
LH: loop header
LB: loop body
LE: loop exit
PB: predicated region body
PF: predicated region fallthrough
CT: control target
= control target key end

     0   :  { %7 = vsyncpa [#allocation3], 0  ;;  %s251_s0 = inlined_call_operand.hbm [shape: f32[16,128], index: 0, kind: input, shape index: {}]   ;;  %s252_s1 = inlined_call_operand.hbm [shape: f32[16,128], index: 1, kind: input, shape index: {}]   ;;  %s253_s2 = inlined_call_operand.hbm [shape: f32[8,128], index: 2, kind: output, shape index: {}]  }
   0x1   :  { %8 = vsyncpa [#allocation6], 0 }
   0x2   :  { %9 = vsyncpa [#allocation4], 0  ;;  %s195_s9 = smov [#allocation2]   ;;  %s123_s13 = scalar_lea.hbm %s251_s0, 256 }
   0x3   :  { %s21_s10 = sshll.u32 %s195_s9, 4  ;;  %p124_p0 = scmp.ne.s32.totalorder %s251_s0, %s123_s13  ;;  %s22_s10 = int_to_ptr.vmem [resolvable:$true] %s21_s10 }
   0x4   :  { %p127_p1 = scmp.lt.u32.totalorder %s123_s13, %s251_s0 }
   0x6   :  { %p129_p2 = pnand %p127_p1, %p124_p0 }
   0x8   :  { %132 = shalt.err (!%p129_p2)
}
   0x9   :  { %s133_s18 = scalar_lea.vmem %s22_s10, 256  ;;  %p138_p4 = scmp.lt.s32.totalorder %s22_s10, %s22_s10 }
   0xa   :  { %p134_p3 = scmp.ne.s32.totalorder %s22_s10, %s133_s18  ;;  %p139_p5 = scmp.lt.s32.totalorder %s133_s18, %s133_s18 }
   0xc   :  { %p140_p6 = por %p139_p5, %p138_p4 }
   0xe   :  { %p141_p7 = pnand %p140_p6, %p134_p3 }
  0x10   :  { %144 = shalt.err (!%p141_p7)
}
  0x11   :  { %s196_s19 = smov 128   ;;  %s197_s20 = smov 8  }
  0x12   :  { %27 = dma.hbm_to_vmem [thread:$0]  %s251_s0, 256, %s22_s10, [#allocation3], %s196_s19, %s196_s19, %s197_s20  }
  0x13   :  { %s198_s23 = smov [#allocation5]   ;;  %s145_s27 = scalar_lea.hbm %s252_s1, 256 }
  0x14   :  { %s39_s24 = sshll.u32 %s198_s23, 4  ;;  %p146_p8 = scmp.ne.s32.totalorder %s252_s1, %s145_s27  ;;  %s40_s24 = int_to_ptr.vmem [resolvable:$true] %s39_s24 }
  0x15   :  { %p149_p9 = scmp.lt.u32.totalorder %s145_s27, %s252_s1 }
  0x17   :  { %p151_p10 = pnand %p149_p9, %p146_p8 }
  0x19   :  { %154 = shalt.err (!%p151_p10)
}
  0x1a   :  { %s155_s4 = scalar_lea.vmem %s40_s24, 256  ;;  %p160_p12 = scmp.lt.s32.totalorder %s40_s24, %s40_s24 }
  0x1b   :  { %p156_p11 = scmp.ne.s32.totalorder %s40_s24, %s155_s4  ;;  %p161_p13 = scmp.lt.s32.totalorder %s155_s4, %s155_s4 }
  0x1d   :  { %p162_p0 = por %p161_p13, %p160_p12 }
  0x1f   :  { %p163_p1 = pnand %p162_p0, %p156_p11 }
  0x21   :  { %166 = shalt.err (!%p163_p1)
}
  0x22   :  { %45 = dma.hbm_to_vmem [thread:$0]  %s252_s1, 256, %s40_s24, [#allocation6], %s196_s19, %s196_s19, %s197_s20  }
  0x23   :  { %189 = dma.done.wait [#allocation3], 256  }
  0x24   :  { %190 = vsyncadd [#allocation3], 4294967040 }
  0x25   :  { %191 = dma.done.wait [#allocation6], 256  }
  0x26   :  { %192 = vsyncadd [#allocation6], 4294967040  ;;  %v65_v0 = vld [vmem:[#allocation2] sm:$0xff]  ;;  %v66_v1 = vld [vmem:[#allocation2 + $0x8] sm:$0xff]  ;;  %s199_s1 = smov [#allocation7]  }
  0x27   :  { %v67_v2 = vld [vmem:[#allocation5] sm:$0xff]  ;;  %v68_v3 = vld [vmem:[#allocation5 + $0x8] sm:$0xff]  ;;  %115 = vlog2.f32 %v65_v0  ;;  %s95_s6 = sshll.u32 %s199_s1, 4  ;;  %s96_s6 = int_to_ptr.vmem [resolvable:$true] %s95_s6 }
  0x28   :  { %v75_v4 = vsub.f32 1.0, %v67_v2  ;;  %117 = vlog2.f32 %v66_v1  ;;  %v76_v5 = vsub.f32 1.0, %v68_v3  ;;  %s167_s7 = scalar_lea.vmem %s96_s6, 128  ;;  %p172_p3 = scmp.lt.s32.totalorder %s96_s6, %s96_s6 }
  0x29   :  { %p168_p2 = scmp.ne.s32.totalorder %s96_s6, %s167_s7  ;;  %p173_p4 = scmp.lt.s32.totalorder %s167_s7, %s167_s7 }
  0x2a   :  { %119 = vlog2.f32 %v75_v4 }
  0x2b   :  { %121 = vlog2.f32 %v76_v5  ;;  %p174_p5 = por %p173_p4, %p172_p3 }
  0x2d   :  { %p175_p6 = pnand %p174_p5, %p168_p2 }
  0x31   :  { %v116_v6 = vpop.eup %115 }
  0x32   :  { %v118_v7 = vpop.eup %117  ;;  %v70_v8 = vmul.f32 0.6931472, %v116_v6 }
  0x33   :  { %v72_v10 = vmul.f32 0.6931472, %v118_v7 }
  0x34   :  { %v120_v9 = vpop.eup %119  ;;  %v73_v12 = vmax.f32 %v70_v8, -100.0 }
  0x35   :  { %v122_v11 = vpop.eup %121  ;;  %v78_v13 = vmul.f32 0.6931472, %v120_v9  ;;  %v74_v14 = vmax.f32 %v72_v10, -100.0 }
  0x36   :  { %v80_v15 = vmul.f32 0.6931472, %v122_v11 }
  0x37   :  { %v81_v16 = vmax.f32 %v78_v13, -100.0 }
  0x38   :  { %v82_v17 = vmax.f32 %v80_v15, -100.0 }
  0x39   :  { %v83_v18 = vadd.f32 %v81_v16, %v73_v12 }
  0x3a   :  { %v84_v19 = vadd.f32 %v82_v17, %v74_v14 }
  0x3c   :  { %v85_v20 = vadd.f32 %v84_v19, %v83_v18 }
  0x3e   :  { %v87_v21 = vsub.f32 0.0, %v85_v20 }
  0x40   :  { %88 = vst [vmem:[#allocation7] sm:$0xff] %v87_v21 }
  0x41   :  { %178 = shalt.err (!%p175_p6)
}
  0x42   :  { %s179_s10 = scalar_lea.hbm %s253_s2, 128 }
  0x43   :  { %p180_p7 = scmp.ne.s32.totalorder %s253_s2, %s179_s10  ;;  %p183_p8 = scmp.lt.u32.totalorder %s179_s10, %s253_s2 }
  0x45   :  { %p185_p9 = pnand %p183_p8, %p180_p7 }
  0x47   :  { %188 = shalt.err (!%p185_p9)
}
  0x48   :  { %98 = dma.vmem_to_hbm [thread:$0]  %s96_s6, 128, %s253_s2, [#allocation4]  }
  0x49   :  { %193 = dma.done.wait [#allocation4], 128  }
  0x4a   :  { %194 = vsyncadd [#allocation4], 4294967168 }
  0x4b   :  { %102 = vsyncpa [#allocation3], 1 }
  0x4c   :  { %103 = vsyncpa [#allocation6], 1 }
  0x4d   :  { %104 = vsyncpa [#allocation4], 1 }

</bundles_post_ra>
